<compile_context>
chip_gen: v6e
topology: v6e:2x2x1
jax: 0.10.0
libtpu: 0.0.40
codegen_flags: <defaults>
</compile_context>

<pallas_src>
import jax
import jax.numpy as jnp
from jax.experimental import pallas as pl
from jax.experimental.pallas import tpu as pltpu

# ----------------------------- MANO constants -----------------------------
N_VERTS = 778
N_JOINTS = 16
N_POSEFEAT = 135          # 15 joints * 9 (rotmat - I) features
N_BETAS = 10
NCOMPS = 6
ROT = 3                   # axis-angle root rotation

NCHUNKS = 2               # vertex chunks (grid steps; one per TensorCore on v7x)
CHUNK = 512               # 4 * 128 lanes per chunk
V_PAD = NCHUNKS * CHUNK   # 778 -> 1024
P_PAD = 136               # 135 -> 136 (sublane multiple of 8)


# ----------------------------- fused Pallas kernel -----------------------------
def _mano_fused_kernel(pose_ref, dirs_ref, shaped_ref, a_ref, w_ref, out_ref):
    """One vertex chunk: pose blend (bf16 x bf16 -> f32 on MXU) + LBS combine.

    pose_ref   (B, P_PAD)        f32   pose-map features (rotmat - I), zero-padded
    dirs_ref   (P_PAD, 3*CHUNK)  bf16  posedirs, coordinate-major within this chunk
    shaped_ref (1, 3*CHUNK)      f32   rest shape (x|y|z lanes) for this chunk
    a_ref      (16*B, 16)        f32   skin transforms, row = (4*k+c)*B + b, col = j
    w_ref      (16, CHUNK)       f32   skinning weights^T for this chunk
    out_ref    (3, B, CHUNK)     f32   out[c, b, v] = skinned coordinate c
    """
    f32 = jnp.float32
    B = out_ref.shape[1]
    C = out_ref.shape[2]

    # --- pose blend shapes: v_posed[b, k*C + v] (coordinate-major rest positions) ---
    v_posed = (
        jnp.dot(pose_ref[...].astype(jnp.bfloat16), dirs_ref[...],
                preferred_element_type=f32)
        + shaped_ref[...]
    )                                                                 # (B, 3*C)

    # --- skinning transforms: t[(4k+c)*B + b, v] = sum_j A[b,j,c,k] * W[v,j] --------
    t = jnp.dot(a_ref[...], w_ref[...], preferred_element_type=f32)   # (16*B, C)

    for c in range(3):                                    # output coordinate
        acc = t[(12 + c) * B:(13 + c) * B, :]             # k=3 (homogeneous 1) term
        for k in range(3):                                # rest x / y / z terms
            acc = acc + v_posed[:, k * C:(k + 1) * C] * \
                t[(4 * k + c) * B:(4 * k + c + 1) * B, :]
        out_ref[c] = acc                                   # contiguous (B, C) store


def mano_skin_pallas(pose_map_pad, dirs_bf16, shaped_chunks, a_perm, w_chunks):
    B = pose_map_pad.shape[0]
    return pl.pallas_call(
        _mano_fused_kernel,
        out_shape=jax.ShapeDtypeStruct((NCHUNKS, 3, B, CHUNK), jnp.float32),
        grid=(NCHUNKS,),
        in_specs=[
            pl.BlockSpec((B, P_PAD), lambda i: (0, 0)),
            pl.BlockSpec((None, P_PAD, 3 * CHUNK), lambda i: (i, 0, 0)),
            pl.BlockSpec((None, 1, 3 * CHUNK), lambda i: (i, 0, 0)),
            pl.BlockSpec((B * N_JOINTS, N_JOINTS), lambda i: (0, 0)),
            pl.BlockSpec((None, N_JOINTS, CHUNK), lambda i: (i, 0, 0)),
        ],
        out_specs=pl.BlockSpec((None, 3, B, CHUNK), lambda i: (i, 0, 0, 0)),
        compiler_params=pltpu.CompilerParams(dimension_semantics=("parallel",)),
    )(pose_map_pad, dirs_bf16, shaped_chunks, a_perm, w_chunks)


def _skin_reference(pose_pad, a_perm, dirs, shaped, w):
    """Plain-JAX replica of the kernel math (per chunk). dirs may be bf16 or f32."""
    f32 = jnp.float32
    B = pose_pad.shape[0]
    C = w.shape[2]
    outs = []
    for i in range(dirs.shape[0]):
        v_posed = (
            jnp.dot(pose_pad.astype(dirs.dtype), dirs[i], preferred_element_type=f32)
            + shaped[i]
        )                                                              # (B, 3*C)
        t = jnp.dot(a_perm, w[i], preferred_element_type=f32)          # (16*B, C)
        rows = []
        for c in range(3):
            acc = t[(12 + c) * B:(13 + c) * B, :]
            for k in range(3):
                acc = acc + v_posed[:, k * C:(k + 1) * C] * \
                    t[(4 * k + c) * B:(4 * k + c + 1) * B, :]
            rows.append(acc)
        outs.append(jnp.stack(rows, axis=0))                           # (3, B, C)
    return jnp.stack(outs, axis=0)                                     # (NCHUNKS, 3, B, C)


# ----------------------------- math glue (plain JAX) -----------------------------
def quat2mat(quat):
    nq = quat / jnp.linalg.norm(quat, axis=1, keepdims=True)
    w, x, y, z = nq[:, 0], nq[:, 1], nq[:, 2], nq[:, 3]
    w2, x2, y2, z2 = w * w, x * x, y * y, z * z
    wx, wy, wz = w * x, w * y, w * z
    xy, xz, yz = x * y, x * z, y * z
    return jnp.stack(
        [
            w2 + x2 - y2 - z2, 2 * xy - 2 * wz, 2 * wy + 2 * xz,
            2 * wz + 2 * xy, w2 - x2 + y2 - z2, 2 * yz - 2 * wx,
            2 * xz - 2 * wy, 2 * wx + 2 * yz, w2 - x2 - y2 + z2,
        ],
        axis=1,
    )  # (N, 9)


def batch_rodrigues(axisang):
    # NOTE: 1e-8 added to each component (matches the original PyTorch layer's quirk).
    angle = jnp.linalg.norm(axisang + 1e-8, axis=1, keepdims=True)
    normalized = axisang / angle
    half = angle * 0.5
    quat = jnp.concatenate([jnp.cos(half), jnp.sin(half) * normalized], axis=1)
    return quat2mat(quat)


def th_posemap_axisang(full_pose):
    B = full_pose.shape[0]
    rot_nb = full_pose.shape[1] // 3
    rot_mats = batch_rodrigues(full_pose.reshape(-1, 3)).reshape(B, rot_nb * 9)
    flat_id = jnp.tile(jnp.eye(3, dtype=full_pose.dtype).reshape(9), rot_nb)
    pose_maps = rot_mats - flat_id[None, :]
    return pose_maps, rot_mats


def th_with_zeros(t):  # (N,3,4) -> (N,4,4)
    N = t.shape[0]
    bottom = jnp.broadcast_to(
        jnp.array([0.0, 0.0, 0.0, 1.0], t.dtype).reshape(1, 1, 4), (N, 1, 4)
    )
    return jnp.concatenate([t, bottom], axis=1)


# ----------------------------- ManoLayer (JAX + Pallas) -----------------------------
class ManoLayerPallas:
    """Matches manolayer_old.ManoLayer with defaults:
    center_idx=None, flat_hand_mean=True, ncomps=6, side='right', use_pca=True,
    root_rot_mode='axisang', joint_rot_mode='axisang', return_transf/full_pose=False.
    MANO .pkl buffers are synthesized deterministically (no file I/O)."""

    def __init__(self, key):
        keys = jax.random.split(key, 7)
        f32 = jnp.float32
        self.th_betas = 0.1 * jax.random.normal(keys[0], (1, N_BETAS), f32)
        self.th_shapedirs = 0.01 * jax.random.normal(keys[1], (N_VERTS, 3, N_BETAS), f32)
        self.th_posedirs = 0.01 * jax.random.normal(keys[2], (N_VERTS, 3, N_POSEFEAT), f32)
        self.th_v_template = 0.1 * jax.random.normal(keys[3], (1, N_VERTS, 3), f32)
        jr = jax.random.uniform(keys[4], (N_JOINTS, N_VERTS), f32)
        self.th_J_regressor = jr / jnp.sum(jr, axis=1, keepdims=True)
        w = jax.random.uniform(keys[5], (N_VERTS, N_JOINTS), f32)
        self.th_weights = w / jnp.sum(w, axis=1, keepdims=True)
        self.th_hands_mean = jnp.zeros((1, 45), f32)  # flat_hand_mean=True
        self.th_selected_comps = 0.1 * jax.random.normal(keys[6], (NCOMPS, 45), f32)

        # --- betas-only constants (hoisted out of the per-call path) ---------------
        th_v_shaped = (
            jnp.matmul(self.th_shapedirs, self.th_betas.T).transpose(2, 0, 1)
            + self.th_v_template
        )                                                              # (1, 778, 3)
        self.th_j_base = jnp.matmul(self.th_J_regressor, th_v_shaped)  # (1, 16, 3)

        # Rest shape, vertex-chunk-major, coordinate-major within a chunk:
        # shaped_chunks[i, 0, k*CHUNK + v] = v_shaped[i*CHUNK + v, k]
        sh_pad = jnp.zeros((3, V_PAD), f32).at[:, :N_VERTS].set(th_v_shaped[0].T)
        self.shaped_chunks = (
            sh_pad.reshape(3, NCHUNKS, CHUNK).transpose(1, 0, 2)
            .reshape(NCHUNKS, 1, 3 * CHUNK)
        )

        # posedirs, vertex-chunk-major: dirs[i, p, k*CHUNK + v] = posedirs[i*CHUNK+v, k, p]
        pd_cm = jnp.transpose(self.th_posedirs, (2, 1, 0))              # (135, 3, 778)
        pd_pad = jnp.zeros((P_PAD, 3, V_PAD), f32).at[:N_POSEFEAT, :, :N_VERTS].set(pd_cm)
        dirs_f32 = (
            pd_pad.reshape(P_PAD, 3, NCHUNKS, CHUNK).transpose(2, 0, 1, 3)
            .reshape(NCHUNKS, P_PAD, 3 * CHUNK)
        )
        self.dirs_f32 = dirs_f32                       # f32 copy (reference path only)
        self.dirs_bf16 = dirs_f32.astype(jnp.bfloat16)  # kernel weights (halves DMA)

        # skinning weights^T, chunked: w_chunks[i, j, v] = th_weights[i*CHUNK + v, j]
        w_t = jnp.zeros((N_JOINTS, V_PAD), f32).at[:, :N_VERTS].set(self.th_weights.T)
        self.w_chunks = w_t.reshape(N_JOINTS, NCHUNKS, CHUNK).transpose(1, 0, 2)

    def __call__(self, th_pose_coeffs, mode="pallas"):
        B = th_pose_coeffs.shape[0]
        f32 = jnp.float32

        # --- pose PCA + full pose ---------------------------------------------------
        th_hand_pose_coeffs = th_pose_coeffs[:, ROT:ROT + NCOMPS]
        th_full_hand_pose = th_hand_pose_coeffs @ self.th_selected_comps          # (B,45)
        th_full_pose = jnp.concatenate(
            [th_pose_coeffs[:, :ROT], self.th_hands_mean + th_full_hand_pose], axis=1
        )                                                                          # (B,48)
        th_pose_map, th_rot_map = th_posemap_axisang(th_full_pose)                 # (B,144)
        root_rot = th_rot_map[:, :9].reshape(B, 3, 3)
        th_rot_map = th_rot_map[:, 9:]                                             # (B,135)
        th_pose_map = th_pose_map[:, 9:]                                           # (B,135)

        th_j = jnp.tile(self.th_j_base, (B, 1, 1))                                 # (B,16,3)
        pose_map_pad = jnp.zeros((B, P_PAD), f32).at[:, :N_POSEFEAT].set(th_pose_map)

        # --- kinematic chain (16 tiny 4x4 transforms, serial — plain JAX) -----------
        root_j = th_j[:, 0, :].reshape(B, 3, 1)
        root_trans = th_with_zeros(jnp.concatenate([root_rot, root_j], axis=2))    # (B,4,4)
        all_rots = th_rot_map.reshape(B, 15, 3, 3)
        lev1_idxs = [1, 4, 7, 10, 13]
        lev2_idxs = [2, 5, 8, 11, 14]
        lev3_idxs = [3, 6, 9, 12, 15]
        lev1_rots = all_rots[:, [i - 1 for i in lev1_idxs]]
        lev2_rots = all_rots[:, [i - 1 for i in lev2_idxs]]
        lev3_rots = all_rots[:, [i - 1 for i in lev3_idxs]]
        lev1_j = th_j[:, lev1_idxs]
        lev2_j = th_j[:, lev2_idxs]
        lev3_j = th_j[:, lev3_idxs]

        all_transforms = [root_trans[:, None]]
        lev1_j_rel = lev1_j - root_j.transpose(0, 2, 1)
        lev1_rel = th_with_zeros(
            jnp.concatenate([lev1_rots, lev1_j_rel[..., None]], axis=3).reshape(-1, 3, 4)
        )
        root_trans_flt = jnp.tile(root_trans[:, None], (1, 5, 1, 1)).reshape(B * 5, 4, 4)
        lev1_flt = jnp.matmul(root_trans_flt, lev1_rel)
        all_transforms.append(lev1_flt.reshape(B, 5, 4, 4))
        lev2_j_rel = lev2_j - lev1_j
        lev2_rel = th_with_zeros(
            jnp.concatenate([lev2_rots, lev2_j_rel[..., None]], axis=3).reshape(-1, 3, 4)
        )
        lev2_flt = jnp.matmul(lev1_flt, lev2_rel)
        all_transforms.append(lev2_flt.reshape(B, 5, 4, 4))
        lev3_j_rel = lev3_j - lev2_j
        lev3_rel = th_with_zeros(
            jnp.concatenate([lev3_rots, lev3_j_rel[..., None]], axis=3).reshape(-1, 3, 4)
        )
        lev3_flt = jnp.matmul(lev2_flt, lev3_rel)
        all_transforms.append(lev3_flt.reshape(B, 5, 4, 4))

        reorder_idxs = [0, 1, 6, 11, 2, 7, 12, 3, 8, 13, 4, 9, 14, 5, 10, 15]
        th_results = jnp.concatenate(all_transforms, axis=1)[:, reorder_idxs]      # (B,16,4,4)
        th_results_global = th_results

        joint_js = jnp.concatenate([th_j, jnp.zeros((B, 16, 1), f32)], axis=2)     # (B,16,4)
        tmp2 = jnp.matmul(th_results, joint_js[..., None])                         # (B,16,4,1)
        th_results2 = th_results - jnp.concatenate(
            [jnp.zeros((B, 16, 4, 3), f32), tmp2], axis=3
        )                                                                          # (B,16,4,4)

        # a_perm[(4*k + c)*B + b, j] = th_results2[b, j, c, k]   (contiguous (k,c) slabs)
        a_perm = jnp.transpose(th_results2, (3, 2, 0, 1)).reshape(16 * B, N_JOINTS)

        # --- fused Pallas kernel: pose blend + linear blend skinning ----------------
        if mode == "pallas":
            out = mano_skin_pallas(
                pose_map_pad, self.dirs_bf16, self.shaped_chunks, a_perm, self.w_chunks
            )
        elif mode == "ref_bf16":   # same math as the kernel, plain XLA
            out = _skin_reference(
                pose_map_pad, a_perm, self.dirs_bf16, self.shaped_chunks, self.w_chunks
            )
        elif mode == "ref_f32":    # full-precision reference
            out = _skin_reference(
                pose_map_pad, a_perm, self.dirs_f32, self.shaped_chunks, self.w_chunks
            )
        else:
            raise ValueError(mode)
        # out: (NCHUNKS, 3, B, CHUNK) -> (B, 778, 3)
        verts_pad = jnp.transpose(out, (2, 0, 3, 1)).reshape(B, V_PAD, 3)
        th_verts = verts_pad[:, :N_VERTS, :]

        # --- joints, tips, reorder ---------------------------------------------------
        th_jtr = th_results_global[:, :, :3, 3]                                    # (B,16,3)
        tips = th_verts[:, jnp.array([745, 317, 444, 556, 673])]                   # side='right'
        th_jtr = jnp.concatenate([th_jtr, tips], axis=1)                           # (B,21,3)
        th_jtr = th_jtr[
            :, jnp.array([0, 13, 14, 15, 16, 1, 2, 3, 17, 4, 5, 6, 18, 10, 11, 12, 19, 7, 8, 9, 20])
        ]

        # th_trans defaults to zeros and center_idx is None -> subtract zero center.
        center_joint = jnp.zeros_like(th_jtr[:, 0:1])
        th_jtr = th_jtr - center_joint
        th_verts = th_verts - center_joint
        # TODO(synk): return_transf / return_full_pose branches omitted (defaults are False).
        return th_verts, th_jtr


# ----------------------------- main -----------------------------
if __name__ == "__main__":
    key = jax.random.PRNGKey(0)
    k_layer, k_pose = jax.random.split(key)

    layer = ManoLayerPallas(k_layer)
    batch = 2
    th_pose_coeffs = 0.5 * jax.random.normal(k_pose, (batch, ROT + NCOMPS), jnp.float32)

    fwd_pallas = jax.jit(lambda p: layer(p, mode="pallas"))
    fwd_ref_bf16 = jax.jit(lambda p: layer(p, mode="ref_bf16"))
    fwd_ref_f32 = jax.jit(lambda p: layer(p, mode="ref_f32"))

    verts, jtr = fwd_pallas(th_pose_coeffs)
    jax.block_until_ready((verts, jtr))
    verts_b, jtr_b = fwd_ref_bf16(th_pose_coeffs)
    jax.block_until_ready((verts_b, jtr_b))
    verts_f, jtr_f = fwd_ref_f32(th_pose_coeffs)
    jax.block_until_ready((verts_f, jtr_f))

    assert verts.shape == (batch, N_VERTS, 3), verts.shape
    assert jtr.shape == (batch, 21, 3), jtr.shape
    assert bool(jnp.all(jnp.isfinite(verts))) and bool(jnp.all(jnp.isfinite(jtr)))
    # Kernel vs identical-math XLA reference (both bf16 posedirs, f32 accumulation).
    assert float(jnp.max(jnp.abs(verts - verts_b))) < 2e-4
    assert float(jnp.max(jnp.abs(jtr - jtr_b))) < 2e-4
    # Kernel vs full-f32 reference (bounds the bf16 weight-downcast error).
    assert float(jnp.max(jnp.abs(verts - verts_f))) < 5e-3
    assert float(jnp.max(jnp.abs(jtr - jtr_f))) < 5e-3

    print("KERNEL_OK")
</pallas_src>

<mosaic_0001>
module attributes {stable_mosaic.version = 11 : i64} {
  func.func @_mano_fused_kernel(%arg0: i32, %arg1: memref<2x136xf32, #tpu.memory_space<vmem>>, %arg2: memref<1x136x1536xbf16, #tpu.memory_space<vmem>>, %arg3: memref<1x1x1536xf32, #tpu.memory_space<vmem>>, %arg4: memref<32x16xf32, #tpu.memory_space<vmem>>, %arg5: memref<1x16x512xf32, #tpu.memory_space<vmem>>, %arg6: memref<1x3x2x512xf32, #tpu.memory_space<vmem>>) attributes {dimension_semantics = [#tpu.dimension_semantics<parallel>], iteration_bounds = array<i64: 2>, scalar_prefetch = 0 : i64, scratch_operands = 0 : i64, tpu.core_type = #tpu.core_type<tc>, window_params = [{pipeline_mode = #tpu.pipeline_mode<synchronous>, transform_indices = @transform_0, window_bounds = array<i64: 2, 136>}, {transform_indices = @transform_1, window_bounds = array<i64: 1, 136, 1536>}, {transform_indices = @transform_2, window_bounds = array<i64: 1, 1, 1536>}, {pipeline_mode = #tpu.pipeline_mode<synchronous>, transform_indices = @transform_3, window_bounds = array<i64: 32, 16>}, {transform_indices = @transform_4, window_bounds = array<i64: 1, 16, 512>}, {transform_indices = @transform_5, window_bounds = array<i64: 1, 3, 2, 512>}]} {
    %c0 = arith.constant 0 : index
    %c0_0 = arith.constant 0 : index
    %0 = vector.load %arg1[%c0, %c0_0] : memref<2x136xf32, #tpu.memory_space<vmem>>, vector<2x136xf32>
    %1 = arith.truncf %0 : vector<2x136xf32> to vector<2x136xbf16>
    %c0_1 = arith.constant 0 : index
    %c0_2 = arith.constant 0 : index
    %c0_3 = arith.constant 0 : index
    %2 = vector.load %arg2[%c0_1, %c0_2, %c0_3] : memref<1x136x1536xbf16, #tpu.memory_space<vmem>>, vector<1x136x1536xbf16>
    %3 = vector.shape_cast %2 : vector<1x136x1536xbf16> to vector<136x1536xbf16>
    %cst = arith.constant dense<0.000000e+00> : vector<2x1536xf32>
    %4 = tpu.matmul %1, %3, %cst {dimension_numbers = #tpu.dot_dimension_numbers<[1], [0], [0], [1], [0, 0, 1, 1], [], []>} : vector<2x136xbf16>, vector<136x1536xbf16>, vector<2x1536xf32> -> vector<2x1536xf32>
    %c0_4 = arith.constant 0 : index
    %c0_5 = arith.constant 0 : index
    %c0_6 = arith.constant 0 : index
    %5 = vector.load %arg3[%c0_4, %c0_5, %c0_6] : memref<1x1x1536xf32, #tpu.memory_space<vmem>>, vector<1x1x1536xf32>
    %6 = vector.shape_cast %5 : vector<1x1x1536xf32> to vector<1x1536xf32>
    %7 = vector.broadcast %6 : vector<1x1536xf32> to vector<2x1536xf32>
    %8 = arith.addf %4, %7 : vector<2x1536xf32>
    %c0_7 = arith.constant 0 : index
    %c0_8 = arith.constant 0 : index
    %9 = vector.load %arg4[%c0_7, %c0_8] : memref<32x16xf32, #tpu.memory_space<vmem>>, vector<32x16xf32>
    %c0_9 = arith.constant 0 : index
    %c0_10 = arith.constant 0 : index
    %c0_11 = arith.constant 0 : index
    %10 = vector.load %arg5[%c0_9, %c0_10, %c0_11] : memref<1x16x512xf32, #tpu.memory_space<vmem>>, vector<1x16x512xf32>
    %11 = vector.shape_cast %10 : vector<1x16x512xf32> to vector<16x512xf32>
    %cst_12 = arith.constant dense<0.000000e+00> : vector<32x512xf32>
    %12 = tpu.matmul %9, %11, %cst_12 {dimension_numbers = #tpu.dot_dimension_numbers<[1], [0], [0], [1], [0, 0, 1, 1], [], []>} : vector<32x16xf32>, vector<16x512xf32>, vector<32x512xf32> -> vector<32x512xf32>
    %13 = vector.extract_strided_slice %12 {offsets = [24, 0], sizes = [2, 512], strides = [1, 1]} : vector<32x512xf32> to vector<2x512xf32>
    %14 = vector.extract_strided_slice %8 {offsets = [0, 0], sizes = [2, 512], strides = [1, 1]} : vector<2x1536xf32> to vector<2x512xf32>
    %15 = vector.extract_strided_slice %12 {offsets = [0, 0], sizes = [2, 512], strides = [1, 1]} : vector<32x512xf32> to vector<2x512xf32>
    %16 = arith.mulf %14, %15 : vector<2x512xf32>
    %17 = arith.addf %13, %16 : vector<2x512xf32>
    %18 = vector.extract_strided_slice %8 {offsets = [0, 512], sizes = [2, 512], strides = [1, 1]} : vector<2x1536xf32> to vector<2x512xf32>
    %19 = vector.extract_strided_slice %12 {offsets = [8, 0], sizes = [2, 512], strides = [1, 1]} : vector<32x512xf32> to vector<2x512xf32>
    %20 = arith.mulf %18, %19 : vector<2x512xf32>
    %21 = arith.addf %17, %20 : vector<2x512xf32>
    %22 = vector.extract_strided_slice %8 {offsets = [0, 1024], sizes = [2, 512], strides = [1, 1]} : vector<2x1536xf32> to vector<2x512xf32>
    %23 = vector.extract_strided_slice %12 {offsets = [16, 0], sizes = [2, 512], strides = [1, 1]} : vector<32x512xf32> to vector<2x512xf32>
    %24 = arith.mulf %22, %23 : vector<2x512xf32>
    %25 = arith.addf %21, %24 : vector<2x512xf32>
    %c0_13 = arith.constant 0 : index
    %c0_14 = arith.constant 0 : index
    %c0_15 = arith.constant 0 : index
    %c0_16 = arith.constant 0 : index
    %26 = vector.load %arg6[%c0_13, %c0_14, %c0_15, %c0_16] : memref<1x3x2x512xf32, #tpu.memory_space<vmem>>, vector<1x1x2x512xf32>
    %27 = vector.shape_cast %26 : vector<1x1x2x512xf32> to vector<2x512xf32>
    %28 = vector.shape_cast %25 : vector<2x512xf32> to vector<1x1x2x512xf32>
    tpu.vector_store %arg6[%c0_13, %c0_14, %c0_15, %c0_16], %28 {strides = array<i32>} : memref<1x3x2x512xf32, #tpu.memory_space<vmem>>, vector<1x1x2x512xf32>,
    %29 = vector.extract_strided_slice %12 {offsets = [26, 0], sizes = [2, 512], strides = [1, 1]} : vector<32x512xf32> to vector<2x512xf32>
    %30 = vector.extract_strided_slice %8 {offsets = [0, 0], sizes = [2, 512], strides = [1, 1]} : vector<2x1536xf32> to vector<2x512xf32>
    %31 = vector.extract_strided_slice %12 {offsets = [2, 0], sizes = [2, 512], strides = [1, 1]} : vector<32x512xf32> to vector<2x512xf32>
    %32 = arith.mulf %30, %31 : vector<2x512xf32>
    %33 = arith.addf %29, %32 : vector<2x512xf32>
    %34 = vector.extract_strided_slice %8 {offsets = [0, 512], sizes = [2, 512], strides = [1, 1]} : vector<2x1536xf32> to vector<2x512xf32>
    %35 = vector.extract_strided_slice %12 {offsets = [10, 0], sizes = [2, 512], strides = [1, 1]} : vector<32x512xf32> to vector<2x512xf32>
    %36 = arith.mulf %34, %35 : vector<2x512xf32>
    %37 = arith.addf %33, %36 : vector<2x512xf32>
    %38 = vector.extract_strided_slice %8 {offsets = [0, 1024], sizes = [2, 512], strides = [1, 1]} : vector<2x1536xf32> to vector<2x512xf32>
    %39 = vector.extract_strided_slice %12 {offsets = [18, 0], sizes = [2, 512], strides = [1, 1]} : vector<32x512xf32> to vector<2x512xf32>
    %40 = arith.mulf %38, %39 : vector<2x512xf32>
    %41 = arith.addf %37, %40 : vector<2x512xf32>
    %c0_17 = arith.constant 0 : index
    %c1 = arith.constant 1 : index
    %c0_18 = arith.constant 0 : index
    %c0_19 = arith.constant 0 : index
    %42 = vector.load %arg6[%c0_17, %c1, %c0_18, %c0_19] : memref<1x3x2x512xf32, #tpu.memory_space<vmem>>, vector<1x1x2x512xf32>
    %43 = vector.shape_cast %42 : vector<1x1x2x512xf32> to vector<2x512xf32>
    %44 = vector.shape_cast %41 : vector<2x512xf32> to vector<1x1x2x512xf32>
    tpu.vector_store %arg6[%c0_17, %c1, %c0_18, %c0_19], %44 {strides = array<i32>} : memref<1x3x2x512xf32, #tpu.memory_space<vmem>>, vector<1x1x2x512xf32>,
    %45 = vector.extract_strided_slice %12 {offsets = [28, 0], sizes = [2, 512], strides = [1, 1]} : vector<32x512xf32> to vector<2x512xf32>
    %46 = vector.extract_strided_slice %8 {offsets = [0, 0], sizes = [2, 512], strides = [1, 1]} : vector<2x1536xf32> to vector<2x512xf32>
    %47 = vector.extract_strided_slice %12 {offsets = [4, 0], sizes = [2, 512], strides = [1, 1]} : vector<32x512xf32> to vector<2x512xf32>
    %48 = arith.mulf %46, %47 : vector<2x512xf32>
    %49 = arith.addf %45, %48 : vector<2x512xf32>
    %50 = vector.extract_strided_slice %8 {offsets = [0, 512], sizes = [2, 512], strides = [1, 1]} : vector<2x1536xf32> to vector<2x512xf32>
    %51 = vector.extract_strided_slice %12 {offsets = [12, 0], sizes = [2, 512], strides = [1, 1]} : vector<32x512xf32> to vector<2x512xf32>
    %52 = arith.mulf %50, %51 : vector<2x512xf32>
    %53 = arith.addf %49, %52 : vector<2x512xf32>
    %54 = vector.extract_strided_slice %8 {offsets = [0, 1024], sizes = [2, 512], strides = [1, 1]} : vector<2x1536xf32> to vector<2x512xf32>
    %55 = vector.extract_strided_slice %12 {offsets = [20, 0], sizes = [2, 512], strides = [1, 1]} : vector<32x512xf32> to vector<2x512xf32>
    %56 = arith.mulf %54, %55 : vector<2x512xf32>
    %57 = arith.addf %53, %56 : vector<2x512xf32>
    %c0_20 = arith.constant 0 : index
    %c2 = arith.constant 2 : index
    %c0_21 = arith.constant 0 : index
    %c0_22 = arith.constant 0 : index
    %58 = vector.load %arg6[%c0_20, %c2, %c0_21, %c0_22] : memref<1x3x2x512xf32, #tpu.memory_space<vmem>>, vector<1x1x2x512xf32>
    %59 = vector.shape_cast %58 : vector<1x1x2x512xf32> to vector<2x512xf32>
    %60 = vector.shape_cast %57 : vector<2x512xf32> to vector<1x1x2x512xf32>
    tpu.vector_store %arg6[%c0_20, %c2, %c0_21, %c0_22], %60 {strides = array<i32>} : memref<1x3x2x512xf32, #tpu.memory_space<vmem>>, vector<1x1x2x512xf32>,
    return
  }
  func.func @transform_0(%arg0: i32) -> (i32, i32) {
    %c0_i32 = arith.constant 0 : i32
    %c0_i32_0 = arith.constant 0 : i32
    %c0_i32_1 = arith.constant 0 : i32
    return %c0_i32, %c0_i32_0 : i32, i32
  }
  func.func @transform_1(%arg0: i32) -> (i32, i32, i32) {
    %c0_i32 = arith.constant 0 : i32
    %c0_i32_0 = arith.constant 0 : i32
    %c0_i32_1 = arith.constant 0 : i32
    return %arg0, %c0_i32, %c0_i32_0 : i32, i32, i32
  }
  func.func @transform_2(%arg0: i32) -> (i32, i32, i32) {
    %c0_i32 = arith.constant 0 : i32
    %c0_i32_0 = arith.constant 0 : i32
    %c0_i32_1 = arith.constant 0 : i32
    return %arg0, %c0_i32, %c0_i32_0 : i32, i32, i32
  }
  func.func @transform_3(%arg0: i32) -> (i32, i32) {
    %c0_i32 = arith.constant 0 : i32
    %c0_i32_0 = arith.constant 0 : i32
    %c0_i32_1 = arith.constant 0 : i32
    return %c0_i32, %c0_i32_0 : i32, i32
  }
  func.func @transform_4(%arg0: i32) -> (i32, i32, i32) {
    %c0_i32 = arith.constant 0 : i32
    %c0_i32_0 = arith.constant 0 : i32
    %c0_i32_1 = arith.constant 0 : i32
    return %arg0, %c0_i32, %c0_i32_0 : i32, i32, i32
  }
  func.func @transform_5(%arg0: i32) -> (i32, i32, i32, i32) {
    %c0_i32 = arith.constant 0 : i32
    %c0_i32_0 = arith.constant 0 : i32
    %c0_i32_1 = arith.constant 0 : i32
    %c0_i32_2 = arith.constant 0 : i32
    return %arg0, %c0_i32, %c0_i32_0, %c0_i32_1 : i32, i32, i32, i32
  }
}

</mosaic_0001>

<bundles_post_ra>
// kernel: tile.14
= control target key start
LH: loop header
LB: loop body
LE: loop exit
PB: predicated region body
PF: predicated region fallthrough
CT: control target
= control target key end

     0   :  { %s28_s0 = inlined_call_operand.vmem [shape: f32[9], index: 0, kind: input, shape index: {}]   ;;  %s29_s1 = inlined_call_operand.vmem [shape: f32[16,9], index: 1, kind: output, shape index: {}]  }
   0x1   :  { %v4_v0 = vld [vmem:[%s28_s0] ss:$0 sm:$0xff] }
   0x2   :  { %5 = vst [vmem:[%s29_s1] sm:$0xff] %v4_v0  ;;  %8 = vst [vmem:[%s29_s1 + $0x8] sm:$0xff] %v4_v0 }

// kernel: sub.30
= control target key start
LH: loop header
LB: loop body
LE: loop exit
PB: predicated region body
PF: predicated region fallthrough
CT: control target
= control target key end

     0   :  { %vm9_vm0 = vcmask 15360   ;;  %s142_s12 = smov 126   ;;  %s143_s13 = smov 108   ;;  %vm3_vm1 = vcmask 72704   ;;  %vm13_vm2 = vcmask 56320   ;;  %vm16_vm3 = vcmask 1048560   ;;  %s221_s0 = inlined_call_operand.vmem [shape: f32[16,9], index: 0, kind: input, shape index: {}]   ;;  %s222_s1 = inlined_call_operand.vmem [shape: f32[144], index: 1, kind: output, shape index: {}]  }
   0x1   :  { %v111_v0 = vld [vmem:[%s221_s0 + $0xe] sm:$0x1]   ;;  %v114_v3 = vld [vmem:[%s221_s0 + $0xc] sm:$0x1]   ;;  %v113_v4 = vld [vmem:[%s221_s0 + $0xd] sm:$0x1]  }
   0x2   :  { %v112_v1 = vld [vmem:[%s221_s0 + $0xe] sm:$0x1]   ;;  %26 = vrot.lane.b32.xlu1 %v114_v3, %s143_s13  ;;  %v115_v5 = vld [vmem:[%s221_s0 + $0xb] sm:$0x1]   ;;  %s144_s18 = smov 117   ;;  %s145_s19 = smov 99  }
   0x3   :  { %v10_v2 = vsel %vm9_vm0, %v112_v1, %v111_v0  ;;  %v116_v6 = vld [vmem:[%s221_s0 + $0xa] sm:$0x1]   ;;  %v117_v7 = vld [vmem:[%s221_s0 + $0x9] sm:$0x1]   ;;  %v2_v8 = vld [vmem:[%s221_s0] sm:$0x1]  }
   0x4   :  { %11 = vrot.lane.b32.xlu0 %v10_v2, %s142_s12  ;;  %4 = vst.msk [vmem:[#allocation0] sm:$0x1] %vm3_vm1, %v2_v8   ;;  %s146_s26 = smov 90   ;;  %s147_s27 = smov 81   ;;  %v118_v9 = vld [vmem:[%s221_s0 + $0x8] sm:$0x1]  }
   0x5   :  { %v119_v10 = vld [vmem:[%s221_s0 + $0x7] sm:$0x1]   ;;  %s148_s3 = smov 72   ;;  %s149_s4 = smov 63   ;;  %v120_v11 = vld [vmem:[%s221_s0 + $0x6] sm:$0x1]  }
   0x6   :  { %32 = vrot.lane.b32.xlu1 %v115_v5, %s145_s19  ;;  %v121_v12 = vld [vmem:[%s221_s0 + $0x5] sm:$0x1]   ;;  %s150_s9 = smov 54   ;;  %s151_s10 = smov 45   ;;  %v122_v13 = vld [vmem:[%s221_s0 + $0x4] sm:$0x1]  }
   0x7   :  { %v123_v14 = vld [vmem:[%s221_s0 + $0x3] sm:$0x1]   ;;  %s152_s15 = smov 36   ;;  %s153_s16 = smov 27   ;;  %v124_v15 = vld [vmem:[%s221_s0 + $0x2] sm:$0x1]  }
   0x8   :  { %20 = vrot.lane.b32.xlu0 %v113_v4, %s144_s18  ;;  %v125_v16 = vld [vmem:[%s221_s0 + $0x1] sm:$0x1]   ;;  %s154_s21 = smov 18   ;;  %s155_s22 = smov 9   ;;  %v126_v17 = vld [vmem:[%s221_s0 + $0xf] sm:$0x1]  }
   0x9   :  { %s156_s0 = smov 7   ;;  %vm22_vm4 = vcmask 1032104   ;;  %vm28_vm5 = vcmask 958304   ;;  %vm34_vm6 = vcmask 884504   ;;  %vm40_vm7 = vcmask 810704  }
   0xa   :  { %44 = vrot.lane.b32.xlu1 %v117_v7, %s147_s27  ;;  %vm46_vm8 = vcmask 736904   ;;  %vm52_vm9 = vcmask 663104   ;;  %vm58_vm10 = vcmask 589304   ;;  %vm64_vm11 = vcmask 515504  }
   0xb   :  { %vm70_vm12 = vcmask 441704   ;;  %vm76_vm13 = vcmask 367904   ;;  %vm82_vm14 = vcmask 294104   ;;  %vm88_vm15 = vcmask 220304  }
   0xc   :  { %38 = vrot.lane.b32.xlu0 %v116_v6, %s146_s26  ;;  %vm94_vm0 = vcmask 146504   ;;  %vm100_vm1 = vcmask 130104  }
   0xe   :  { %56 = vrot.lane.b32.xlu1 %v119_v10, %s149_s4 }
  0x10   :  { %50 = vrot.lane.b32.xlu0 %v118_v9, %s148_s3 }
  0x12   :  { %68 = vrot.lane.b32.xlu1 %v121_v12, %s151_s10 }
  0x14   :  { %62 = vrot.lane.b32.xlu0 %v120_v11, %s150_s9 }
  0x16   :  { %80 = vrot.lane.b32.xlu1 %v123_v14, %s153_s16 }
  0x18   :  { %74 = vrot.lane.b32.xlu0 %v122_v13, %s152_s15 }
  0x1a   :  { %92 = vrot.lane.b32.xlu1 %v125_v16, %s155_s22 }
  0x1c   :  { %86 = vrot.lane.b32.xlu0 %v124_v15, %s154_s21 }
  0x20   :  { %98 = vrot.lane.b32.xlu0 %v126_v17, %s156_s0 }
  0x74   :  { %v27_v19 = vpop.permute.xlu1 %26  }
  0x76   :  { %v12_v18 = vpop.permute.xlu0 %11  }
  0x77   :  { %15 = vst.msk [vmem:[#allocation0 + $0x1] sm:$0x1] %vm13_vm2, %v12_v18  }
  0x78   :  { %17 = vst.msk [vmem:[#allocation0] sm:$0x1] %vm16_vm3, %v12_v18   ;;  %v33_v21 = vpop.permute.xlu1 %32  }
  0x7a   :  { %v21_v20 = vpop.permute.xlu0 %20  }
  0x7b   :  { %23 = vst.msk [vmem:[#allocation0] sm:$0x1] %vm22_vm4, %v21_v20  }
  0x7c   :  { %29 = vst.msk [vmem:[#allocation0] sm:$0x1] %vm28_vm5, %v27_v19   ;;  %v45_v23 = vpop.permute.xlu1 %44  }
  0x7d   :  { %35 = vst.msk [vmem:[#allocation0] sm:$0x1] %vm34_vm6, %v33_v21  }
  0x7e   :  { %v39_v22 = vpop.permute.xlu0 %38  }
  0x7f   :  { %41 = vst.msk [vmem:[#allocation0] sm:$0x1] %vm40_vm7, %v39_v22  }
  0x80   :  { %47 = vst.msk [vmem:[#allocation0] sm:$0x1] %vm46_vm8, %v45_v23   ;;  %v57_v25 = vpop.permute.xlu1 %56  }
  0x82   :  { %v51_v24 = vpop.permute.xlu0 %50  }
  0x83   :  { %53 = vst.msk [vmem:[#allocation0] sm:$0x1] %vm52_vm9, %v51_v24  }
  0x84   :  { %59 = vst.msk [vmem:[#allocation0] sm:$0x1] %vm58_vm10, %v57_v25   ;;  %v69_v27 = vpop.permute.xlu1 %68  }
  0x86   :  { %v63_v26 = vpop.permute.xlu0 %62  }
  0x87   :  { %65 = vst.msk [vmem:[#allocation0] sm:$0x1] %vm64_vm11, %v63_v26  }
  0x88   :  { %71 = vst.msk [vmem:[#allocation0] sm:$0x1] %vm70_vm12, %v69_v27   ;;  %v81_v29 = vpop.permute.xlu1 %80  }
  0x8a   :  { %v75_v28 = vpop.permute.xlu0 %74  }
  0x8b   :  { %77 = vst.msk [vmem:[#allocation0] sm:$0x1] %vm76_vm13, %v75_v28  }
  0x8c   :  { %83 = vst.msk [vmem:[#allocation0] sm:$0x1] %vm82_vm14, %v81_v29   ;;  %v93_v31 = vpop.permute.xlu1 %92  }
  0x8e   :  { %v87_v30 = vpop.permute.xlu0 %86  }
  0x8f   :  { %89 = vst.msk [vmem:[#allocation0] sm:$0x1] %vm88_vm15, %v87_v30  }
  0x90   :  { %95 = vst.msk [vmem:[#allocation0] sm:$0x1] %vm94_vm0, %v93_v31  }
  0x92   :  { %v99_v32 = vpop.permute.xlu0 %98  }
  0x93   :  { %102 = vst.msk [vmem:[#allocation0 + $0x1] sm:$0x1] %vm100_vm1, %v99_v32  }
  0x9a   :  { %v107_v33 = vld [vmem:[#allocation0] sm:$0x3] }
  0x9b   :  { %110 = vst [vmem:[%s222_s1] sm:$0x3] %v107_v33 }

// kernel: _lambda_.1
= control target key start
LH: loop header
LB: loop body
LE: loop exit
PB: predicated region body
PF: predicated region fallthrough
CT: control target
= control target key end

     0   :  { %s2149_s18 = smov 0   ;;  %s2436_s0 = inlined_call_operand.vmem [shape: f32[2,136], index: 0, kind: input, shape index: {}]   ;;  %s2437_s1 = inlined_call_operand.vmem [shape: bf16[2,136,1536], index: 1, kind: input, shape index: {}]   ;;  %s2438_s2 = inlined_call_operand.vmem [shape: f32[2,1,1536], index: 2, kind: input, shape index: {}]   ;;  %s2439_s3 = inlined_call_operand.vmem [shape: f32[32,16], index: 3, kind: input, shape index: {}]   ;;  %s2440_s4 = inlined_call_operand.vmem [shape: f32[2,16,512], index: 4, kind: input, shape index: {}]   ;;  %s2441_s5 = inlined_call_operand.vmem [shape: f32[2,3,2,512], index: 5, kind: output, shape index: {}]  }
   0x1 LB: > { %s1797_s19 = sadd.s32 4294967295, %s2115_s18   ;;  %p1801_p0 = scmp.ge.s32.totalorder %s2115_s18, 1  ;;  %s2115_s18 = sphi %s2149_s18, %s15_s18  }
   0x2   : > { %p206_p1 = scmp.lt.s32.totalorder %s2115_s18, 3 }
   0x4   : > { %p207_p2 = pnand %p1801_p0, %p206_p1 }
   0x5   : > { %p243_p3 = scmp.lt.s32.totalorder (!%p207_p2), %s1797_s19, 1 }
   0x6   : > { %210 = sbr.rel (%p207_p2) target bundleno = 367 (0x16f), region = 40 }
   0xb   : > { %v2160_v0 = vld.sshfl [vmem:[%s2436_s0] sm:$0x33 pattern:$0x76325410]  ;;  %s2443_s19 = smov (!%p243_p3, %s1797_s19), 1  ;;  %vm953_vm0 = vcmask 64512  }
   0xc   : > { %v272_v1 = vcombine.high %v2160_v0, %v2160_v0  ;;  %s1940_s22 = smul.u32 816, %s2443_s19  ;;  %vm957_vm1 = vcmask 1043456   ;;  %v2220_v45 = vpack.c.bf16 %v2160_v0, %v2160_v0  ;;  %s1939_s26 = sshll.u32 %s2443_s19, 6  ;;  %vm1252_vm2 = vcmask 130048  }
   0xd   : > { %s256_s29 = scalar_lea.vmem %s2440_s4, %s1939_s26  ;;  %s1941_s13 = smul.u32 12, %s2443_s19 }
   0xe   : > { %v2166_v2 = vpack.c.bf16 %v272_v1, %v272_v1  ;;  %s2176_s25 = scalar_lea.vmem %s2437_s1, %s1940_s22  ;;  %s1942_s17 = smul.u32 24, %s2443_s19 }
   0xf   : > { %v1953_v3 = vld [vmem:[%s2176_s25 + $0x2a4] ss:$48 sps:$4 sm:$0xff]   ;;  %v1955_v4 = vld [vmem:[%s2176_s25 + $0x2ac] ss:$48 sps:$4 sm:$0xff]   ;;  %v1957_v5 = vld [vmem:[%s2176_s25 + $0x2a0] ss:$48 sps:$4 sm:$0xff]   ;;  %s251_s16 = scalar_lea.vmem %s2438_s2, %s1941_s13 }
  0x10   : > { %1916 = vmatprep.mubr.msk.bf16.mxu0 %vm953_vm0, %v2166_v2  ;;  %1918 = vmatprep.mubr.msk.bf16.mxu1 %vm953_vm0, %v2166_v2  ;;  %v1958_v6 = vld [vmem:[%s2176_s25 + $0x2a8] ss:$48 sps:$4 sm:$0xff]   ;;  %v1959_v7 = vld [vmem:[%s2176_s25 + $0x244] ss:$48 sps:$4 sm:$0xff]   ;;  %v1961_v8 = vld [vmem:[%s2176_s25 + $0x24c] ss:$48 sps:$4 sm:$0xff]   ;;  %s261_s21 = scalar_lea.vmem %s2441_s5, %s1942_s17 }
  0x11   : > { %994 = vmatprep.subr.bf16.mxu0 %v1953_v3  ;;  %1035 = vmatprep.subr.bf16.mxu1 %v1955_v4  ;;  %v1963_v9 = vld [vmem:[%s2176_s25 + $0x240] ss:$48 sps:$4 sm:$0xff]   ;;  %v1964_v10 = vld [vmem:[%s2176_s25 + $0x248] ss:$48 sps:$4 sm:$0xff]   ;;  %v1965_v11 = vld [vmem:[%s2176_s25 + $0x1e4] ss:$48 sps:$4 sm:$0xff]  }
  0x12   : > { %995 = vmatpush1.bf16.msra.mxu0 %v1957_v5  ;;  %1036 = vmatpush1.bf16.msra.mxu1 %v1958_v6  ;;  %v1967_v12 = vld [vmem:[%s2176_s25 + $0x1ec] ss:$48 sps:$4 sm:$0xff]   ;;  %v1969_v13 = vld [vmem:[%s2176_s25 + $0x1e0] ss:$48 sps:$4 sm:$0xff]   ;;  %v1970_v14 = vld [vmem:[%s2176_s25 + $0x1e8] ss:$48 sps:$4 sm:$0xff]  }
  0x13   : > { %996 = vmatprep.subr.bf16.mxu0 %v1959_v7  ;;  %1037 = vmatprep.subr.bf16.mxu1 %v1961_v8  ;;  %v1971_v15 = vld [vmem:[%s2176_s25 + $0x184] ss:$48 sps:$4 sm:$0xff]   ;;  %v1973_v16 = vld [vmem:[%s2176_s25 + $0x18c] ss:$48 sps:$4 sm:$0xff]   ;;  %v1975_v17 = vld [vmem:[%s2176_s25 + $0x180] ss:$48 sps:$4 sm:$0xff]  }
  0x14   : > { %v1976_v18 = vld [vmem:[%s2176_s25 + $0x188] ss:$48 sps:$4 sm:$0xff]   ;;  %v1977_v19 = vld [vmem:[%s2176_s25 + $0x124] ss:$48 sps:$4 sm:$0xff]   ;;  %v1979_v20 = vld [vmem:[%s2176_s25 + $0x12c] ss:$48 sps:$4 sm:$0xff]  }
  0x15   : > { %v1981_v21 = vld [vmem:[%s2176_s25 + $0x120] ss:$48 sps:$4 sm:$0xff]   ;;  %v1982_v22 = vld [vmem:[%s2176_s25 + $0x128] ss:$48 sps:$4 sm:$0xff]   ;;  %v1983_v23 = vld [vmem:[%s2176_s25 + $0xc4] ss:$48 sps:$4 sm:$0xff]  }
  0x16   : > { %997 = vmatpush1.bf16.msra.mxu0 %v1963_v9  ;;  %1038 = vmatpush1.bf16.msra.mxu1 %v1964_v10  ;;  %v1985_v24 = vld [vmem:[%s2176_s25 + $0xcc] ss:$48 sps:$4 sm:$0xff]   ;;  %v1987_v25 = vld [vmem:[%s2176_s25 + $0xc0] ss:$48 sps:$4 sm:$0xff]   ;;  %v1988_v26 = vld [vmem:[%s2176_s25 + $0xc8] ss:$48 sps:$4 sm:$0xff]  }
  0x17   : > { %998 = vmatprep.subr.bf16.mxu0 %v1965_v11  ;;  %1039 = vmatprep.subr.bf16.mxu1 %v1967_v12  ;;  %v1989_v27 = vld [vmem:[%s2176_s25 + $0x64] ss:$48 sps:$4 sm:$0xff]   ;;  %v1991_v28 = vld [vmem:[%s2176_s25 + $0x6c] ss:$48 sps:$4 sm:$0xff]   ;;  %v1993_v29 = vld [vmem:[%s2176_s25 + $0x60] ss:$48 sps:$4 sm:$0xff]  }
  0x18   : > { %v1994_v30 = vld [vmem:[%s2176_s25 + $0x68] ss:$48 sps:$4 sm:$0xff]   ;;  %v1995_v31 = vld [vmem:[%s2176_s25 + $0x4] ss:$48 sps:$4 sm:$0xff]   ;;  %v1997_v32 = vld [vmem:[%s2176_s25 + $0xc] ss:$48 sps:$4 sm:$0xff]  }
  0x19   : > { %v373_v33 = vld [vmem:[%s2176_s25 + $0x300] sm:$0xff]  ;;  %v374_v34 = vld [vmem:[%s2176_s25 + $0x308] sm:$0xff]  ;;  %v375_v11 = vld [vmem:[%s2176_s25 + $0x310] sm:$0xff] }
  0x1a   : > { %999 = vmatpush1.bf16.msra.mxu0 %v1969_v13  ;;  %1040 = vmatpush1.bf16.msra.mxu1 %v1970_v14  ;;  %v1999_v35 = vld [vmem:[%s2176_s25] ss:$48 sps:$4 sm:$0xff]   ;;  %v2000_v36 = vld [vmem:[%s2176_s25 + $0x8] ss:$48 sps:$4 sm:$0xff]   ;;  %v1904_v37 = vcombine.high %v373_v33, %v373_v33  ;;  %v1906_v38 = vcombine.high %v374_v34, %v374_v34  ;;  %v1903_v39 = vcombine.low %v373_v33, %v373_v33  ;;  %v2007_v41 = vld [vmem:[%s2176_s25 + $0x2b4] ss:$48 sps:$4 sm:$0xff]  }
  0x1b   : > { %1000 = vmatprep.subr.bf16.mxu0 %v1971_v15  ;;  %1041 = vmatprep.subr.bf16.mxu1 %v1973_v16  ;;  %v1905_v40 = vcombine.low %v374_v34, %v374_v34  ;;  %v2010_v44 = vld [vmem:[%s2176_s25 + $0x2bc] ss:$48 sps:$4 sm:$0xff]   ;;  %v2005_v46 = vld [vmem:[%s2176_s25 + $0x2b0] ss:$48 sps:$4 sm:$0xff]   ;;  %v2008_v47 = vld [vmem:[%s2176_s25 + $0x2b8] ss:$48 sps:$4 sm:$0xff]   ;;  %v1908_v15 = vcombine.high %v375_v11, %v375_v11 }
  0x1c   : > { %v959_v42 = vsel %vm957_vm1, %v1903_v39, 0  ;;  %v2013_v48 = vld [vmem:[%s2176_s25 + $0x254] ss:$48 sps:$4 sm:$0xff]   ;;  %v2016_v49 = vld [vmem:[%s2176_s25 + $0x25c] ss:$48 sps:$4 sm:$0xff]  }
  0x1d   : > { %v965_v43 = vsel %vm957_vm1, %v1905_v40, 0  ;;  %v2011_v50 = vld [vmem:[%s2176_s25 + $0x250] ss:$48 sps:$4 sm:$0xff]   ;;  %v2014_v51 = vld [vmem:[%s2176_s25 + $0x258] ss:$48 sps:$4 sm:$0xff]  }
  0x1e   : > { %1001 = vmatpush1.bf16.msra.mxu0 %v1975_v17  ;;  %1042 = vmatpush1.bf16.msra.mxu1 %v1976_v18  ;;  %v2019_v52 = vld [vmem:[%s2176_s25 + $0x1f4] ss:$48 sps:$4 sm:$0xff]   ;;  %v2022_v53 = vld [vmem:[%s2176_s25 + $0x1fc] ss:$48 sps:$4 sm:$0xff]   ;;  %v2017_v54 = vld [vmem:[%s2176_s25 + $0x1f0] ss:$48 sps:$4 sm:$0xff]   ;;  %v1907_v17 = vcombine.low %v375_v11, %v375_v11 }
  0x1f   : > { %1002 = vmatprep.subr.bf16.mxu0 %v1977_v19  ;;  %1043 = vmatprep.subr.bf16.mxu1 %v1979_v20  ;;  %v2020_v55 = vld [vmem:[%s2176_s25 + $0x1f8] ss:$48 sps:$4 sm:$0xff]   ;;  %v2025_v56 = vld [vmem:[%s2176_s25 + $0x194] ss:$48 sps:$4 sm:$0xff]   ;;  %v2028_v57 = vld [vmem:[%s2176_s25 + $0x19c] ss:$48 sps:$4 sm:$0xff]  }
  0x20   : > { %v2023_v58 = vld [vmem:[%s2176_s25 + $0x190] ss:$48 sps:$4 sm:$0xff]   ;;  %v2026_v59 = vld [vmem:[%s2176_s25 + $0x198] ss:$48 sps:$4 sm:$0xff]   ;;  %v2031_v60 = vld [vmem:[%s2176_s25 + $0x134] ss:$48 sps:$4 sm:$0xff]  }
  0x21   : > { %v2034_v61 = vld [vmem:[%s2176_s25 + $0x13c] ss:$48 sps:$4 sm:$0xff]   ;;  %v2029_v62 = vld [vmem:[%s2176_s25 + $0x130] ss:$48 sps:$4 sm:$0xff]   ;;  %v2032_v63 = vld [vmem:[%s2176_s25 + $0x138] ss:$48 sps:$4 sm:$0xff]  }
  0x22   : > { %1003 = vmatpush1.bf16.msra.mxu0 %v1981_v21  ;;  %1044 = vmatpush1.bf16.msra.mxu1 %v1982_v22  ;;  %v2037_v0 = vld [vmem:[%s2176_s25 + $0xd4] ss:$48 sps:$4 sm:$0xff]   ;;  %v2040_v1 = vld [vmem:[%s2176_s25 + $0xdc] ss:$48 sps:$4 sm:$0xff]   ;;  %v2035_v3 = vld [vmem:[%s2176_s25 + $0xd0] ss:$48 sps:$4 sm:$0xff]  }
  0x23   : > { %1004 = vmatprep.subr.bf16.mxu0 %v1983_v23  ;;  %1045 = vmatprep.subr.bf16.mxu1 %v1985_v24  ;;  %v2038_v4 = vld [vmem:[%s2176_s25 + $0xd8] ss:$48 sps:$4 sm:$0xff]   ;;  %v2043_v5 = vld [vmem:[%s2176_s25 + $0x74] ss:$48 sps:$4 sm:$0xff]   ;;  %v2046_v6 = vld [vmem:[%s2176_s25 + $0x7c] ss:$48 sps:$4 sm:$0xff]  }
  0x24   : > { %v2041_v7 = vld [vmem:[%s2176_s25 + $0x70] ss:$48 sps:$4 sm:$0xff]   ;;  %v2044_v8 = vld [vmem:[%s2176_s25 + $0x78] ss:$48 sps:$4 sm:$0xff]   ;;  %v2049_v9 = vld [vmem:[%s2176_s25 + $0x14] ss:$48 sps:$4 sm:$0xff]  }
  0x25   : > { %v2052_v10 = vld [vmem:[%s2176_s25 + $0x1c] ss:$48 sps:$4 sm:$0xff]   ;;  %v2047_v13 = vld [vmem:[%s2176_s25 + $0x10] ss:$48 sps:$4 sm:$0xff]   ;;  %v2050_v14 = vld [vmem:[%s2176_s25 + $0x18] ss:$48 sps:$4 sm:$0xff]  }
  0x26   : > { %1005 = vmatpush1.bf16.msra.mxu0 %v1987_v25  ;;  %1046 = vmatpush1.bf16.msra.mxu1 %v1988_v26  ;;  %v376_v12 = vld [vmem:[%s2176_s25 + $0x318] sm:$0xff]  ;;  %v971_v19 = vsel %vm957_vm1, %v1907_v17, 0  ;;  %v2059_v21 = vld [vmem:[%s2176_s25 + $0x2c4] ss:$48 sps:$4 sm:$0xff]   ;;  %v2057_v23 = vld [vmem:[%s2176_s25 + $0x2c0] ss:$48 sps:$4 sm:$0xff]  }
  0x27   : > { %1006 = vmatprep.subr.bf16.mxu0 %v1989_v27  ;;  %1047 = vmatprep.subr.bf16.mxu1 %v1991_v28  ;;  %v1910_v16 = vcombine.high %v376_v12, %v376_v12  ;;  %v1909_v18 = vcombine.low %v376_v12, %v376_v12  ;;  %v2062_v22 = vld [vmem:[%s2176_s25 + $0x2cc] ss:$48 sps:$4 sm:$0xff]   ;;  %v2060_v24 = vld [vmem:[%s2176_s25 + $0x2c8] ss:$48 sps:$4 sm:$0xff]   ;;  %v2065_v25 = vld [vmem:[%s2176_s25 + $0x264] ss:$48 sps:$4 sm:$0xff]  }
  0x28   : > { %v2068_v26 = vld [vmem:[%s2176_s25 + $0x26c] ss:$48 sps:$4 sm:$0xff]   ;;  %v2063_v27 = vld [vmem:[%s2176_s25 + $0x260] ss:$48 sps:$4 sm:$0xff]   ;;  %v2066_v28 = vld [vmem:[%s2176_s25 + $0x268] ss:$48 sps:$4 sm:$0xff]  }
  0x29   : > { %v977_v20 = vsel %vm957_vm1, %v1909_v18, 0  ;;  %v2077_v33 = vld [vmem:[%s2176_s25 + $0x1a4] ss:$48 sps:$4 sm:$0xff]   ;;  %v2080_v34 = vld [vmem:[%s2176_s25 + $0x1ac] ss:$48 sps:$4 sm:$0xff]  }
  0x2a   : > { %1007 = vmatpush1.bf16.msra.mxu0 %v1993_v29  ;;  %1048 = vmatpush1.bf16.msra.mxu1 %v1994_v30  ;;  %v2071_v29 = vld [vmem:[%s2176_s25 + $0x204] ss:$48 sps:$4 sm:$0xff]   ;;  %v2074_v30 = vld [vmem:[%s2176_s25 + $0x20c] ss:$48 sps:$4 sm:$0xff]   ;;  %v2084_v39 = vld [vmem:[%s2176_s25 + $0x148] ss:$48 sps:$4 sm:$0xff]  }
  0x2b   : > { %1008 = vmatprep.subr.bf16.mxu0 %v1995_v31  ;;  %1049 = vmatprep.subr.bf16.mxu1 %v1997_v32  ;;  %v2069_v31 = vld [vmem:[%s2176_s25 + $0x200] ss:$48 sps:$4 sm:$0xff]   ;;  %v2072_v32 = vld [vmem:[%s2176_s25 + $0x208] ss:$48 sps:$4 sm:$0xff]   ;;  %v2089_v40 = vld [vmem:[%s2176_s25 + $0xe4] ss:$48 sps:$4 sm:$0xff]  }
  0x2e   : > { %1009 = vmatpush1.bf16.msra.mxu0 %v1999_v35  ;;  %1050 = vmatpush1.bf16.msra.mxu1 %v2000_v36  ;;  %v2075_v35 = vld [vmem:[%s2176_s25 + $0x1a0] ss:$48 sps:$4 sm:$0xff]   ;;  %v2078_v36 = vld [vmem:[%s2176_s25 + $0x1a8] ss:$48 sps:$4 sm:$0xff]  }
  0x2f   : > { %1915 = vmatprep.subr.msk.bf16.mxu0 %vm957_vm1, %v1904_v37  ;;  %1917 = vmatprep.subr.msk.bf16.mxu1 %vm957_vm1, %v1906_v38  ;;  %v2086_v37 = vld [vmem:[%s2176_s25 + $0x14c] ss:$48 sps:$4 sm:$0xff]   ;;  %v2081_v38 = vld [vmem:[%s2176_s25 + $0x140] ss:$48 sps:$4 sm:$0xff]  }
  0x32   : > { %1025 = vmatpush2.bf16.msra.mxu0 %v959_v42  ;;  %1066 = vmatpush2.bf16.msra.mxu1 %v965_v43  ;;  %v2087_v42 = vld [vmem:[%s2176_s25 + $0xe0] ss:$48 sps:$4 sm:$0xff]   ;;  %v2090_v43 = vld [vmem:[%s2176_s25 + $0xe8] ss:$48 sps:$4 sm:$0xff]  }
  0x33   : > { %1076 = vmatprep.subr.bf16.mxu0 %v2007_v41  ;;  %1117 = vmatprep.subr.bf16.mxu1 %v2010_v44  ;;  %v2092_v41 = vld [vmem:[%s2176_s25 + $0xec] ss:$48 sps:$4 sm:$0xff]   ;;  %v2095_v44 = vld [vmem:[%s2176_s25 + $0x84] ss:$48 sps:$4 sm:$0xff]  }
  0x35   : > { %1027 = vmatmul.mubr.bf16.vlgmr.msra.gmra.mxu0 %v2220_v45  ;;  %1068 = vmatmul.mubr.bf16.vlgmr.msra.gmra.mxu1 %v2220_v45 }
  0x36   : > { %1077 = vmatpush1.bf16.msra.mxu0 %v2005_v46  ;;  %1118 = vmatpush1.bf16.msra.mxu1 %v2008_v47  ;;  %v2098_v46 = vld [vmem:[%s2176_s25 + $0x8c] ss:$48 sps:$4 sm:$0xff]   ;;  %v2093_v47 = vld [vmem:[%s2176_s25 + $0x80] ss:$48 sps:$4 sm:$0xff]  }
  0x37   : > { %1078 = vmatprep.subr.bf16.mxu0 %v2013_v48  ;;  %1119 = vmatprep.subr.bf16.mxu1 %v2016_v49  ;;  %v2096_v48 = vld [vmem:[%s2176_s25 + $0x88] ss:$48 sps:$4 sm:$0xff]   ;;  %v2101_v49 = vld [vmem:[%s2176_s25 + $0x24] ss:$48 sps:$4 sm:$0xff]  }
  0x38   : > { %1920 = vmatprep.mubr.msk.bf16.mxu0 %vm953_vm0, %v2166_v2  ;;  %1922 = vmatprep.mubr.msk.bf16.mxu1 %vm953_vm0, %v2166_v2 }
  0x3a   : > { %1079 = vmatpush1.bf16.msra.mxu0 %v2011_v50  ;;  %1120 = vmatpush1.bf16.msra.mxu1 %v2014_v51  ;;  %v2104_v50 = vld [vmem:[%s2176_s25 + $0x2c] ss:$48 sps:$4 sm:$0xff]   ;;  %v377_v51 = vld [vmem:[%s2176_s25 + $0x320] sm:$0xff] }
  0x3b   : > { %1080 = vmatprep.subr.bf16.mxu0 %v2019_v52  ;;  %1121 = vmatprep.subr.bf16.mxu1 %v2022_v53  ;;  %v378_v52 = vld [vmem:[%s2176_s25 + $0x328] sm:$0xff]  ;;  %v2099_v53 = vld [vmem:[%s2176_s25 + $0x20] ss:$48 sps:$4 sm:$0xff]  }
  0x3e   : > { %1081 = vmatpush1.bf16.msra.mxu0 %v2017_v54  ;;  %1122 = vmatpush1.bf16.msra.mxu1 %v2020_v55  ;;  %v2102_v54 = vld [vmem:[%s2176_s25 + $0x28] ss:$48 sps:$4 sm:$0xff]   ;;  %v1912_v55 = vcombine.high %v377_v51, %v377_v51 }
  0x3f   : > { %1082 = vmatprep.subr.bf16.mxu0 %v2025_v56  ;;  %1123 = vmatprep.subr.bf16.mxu1 %v2028_v57  ;;  %v1914_v56 = vcombine.high %v378_v52, %v378_v52  ;;  %v1911_v57 = vcombine.low %v377_v51, %v377_v51 }
  0x42   : > { %1083 = vmatpush1.bf16.msra.mxu0 %v2023_v58  ;;  %1124 = vmatpush1.bf16.msra.mxu1 %v2026_v59  ;;  %v1913_v58 = vcombine.low %v378_v52, %v378_v52  ;;  %v983_v59 = vsel %vm957_vm1, %v1911_v57, 0 }
  0x43   : > { %1084 = vmatprep.subr.bf16.mxu0 %v2031_v60  ;;  %1125 = vmatprep.subr.bf16.mxu1 %v2034_v61  ;;  %v1249_v61 = vld [vmem:[%s256_s29 + $0x28] sm:$0xff] }
  0x44   : > { %v989_v60 = vsel %vm957_vm1, %v1913_v58, 0 }
  0x46   : > { %1085 = vmatpush1.bf16.msra.mxu0 %v2029_v62  ;;  %1126 = vmatpush1.bf16.msra.mxu1 %v2032_v63  ;;  %v1251_v62 = vld [vmem:[%s256_s29 + $0x38] sm:$0xff]  ;;  %v1248_v63 = vld [vmem:[%s256_s29 + $0x20] sm:$0xff] }
  0x47   : > { %1086 = vmatprep.subr.bf16.mxu0 %v2037_v0  ;;  %1127 = vmatprep.subr.bf16.mxu1 %v2040_v1  ;;  %v1250_v0 = vld [vmem:[%s256_s29 + $0x30] sm:$0xff]  ;;  %v1245_v1 = vld [vmem:[%s256_s29 + $0x8] sm:$0xff] }
  0x4a   : > { %1087 = vmatpush1.bf16.msra.mxu0 %v2035_v3  ;;  %1128 = vmatpush1.bf16.msra.mxu1 %v2038_v4  ;;  %v1247_v3 = vld [vmem:[%s256_s29 + $0x18] sm:$0xff]  ;;  %v1244_v4 = vld [vmem:[%s256_s29] sm:$0xff] }
  0x4b   : > { %1088 = vmatprep.subr.bf16.mxu0 %v2043_v5  ;;  %1129 = vmatprep.subr.bf16.mxu1 %v2046_v6  ;;  %v1246_v5 = vld [vmem:[%s256_s29 + $0x10] sm:$0xff]  ;;  %v2117_v6 = vmov 0.0  }
  0x4e   : > { %1089 = vmatpush1.bf16.msra.mxu0 %v2041_v7  ;;  %1130 = vmatpush1.bf16.msra.mxu1 %v2044_v8  ;;  %v1240_v7 = vld [vmem:[%s2439_s3] sm:$0xff]  ;;  %v1242_v8 = vld [vmem:[%s2439_s3 + $0x10] sm:$0xff] }
  0x4f   : > { %1090 = vmatprep.subr.bf16.mxu0 %v2049_v9  ;;  %1131 = vmatprep.subr.bf16.mxu1 %v2052_v10  ;;  %v1243_v9 = vld [vmem:[%s2439_s3 + $0x18] sm:$0xff] }
  0x52   : > { %1091 = vmatpush1.bf16.msra.mxu0 %v2047_v13  ;;  %1132 = vmatpush1.bf16.msra.mxu1 %v2050_v14 }
  0x53   : > { %1919 = vmatprep.subr.msk.bf16.mxu0 %vm957_vm1, %v1908_v15  ;;  %1921 = vmatprep.subr.msk.bf16.mxu1 %vm957_vm1, %v1910_v16 }
  0x56   : > { %1107 = vmatpush2.bf16.msra.mxu0 %v971_v19  ;;  %1148 = vmatpush2.bf16.msra.mxu1 %v977_v20 }
  0x57   : > { %1158 = vmatprep.subr.bf16.mxu0 %v2059_v21  ;;  %1199 = vmatprep.subr.bf16.mxu1 %v2062_v22 }
  0x59   : > { %1109 = vmatmul.mubr.bf16.vlgmr.msra.gmra.mxu0 %v2220_v45  ;;  %1150 = vmatmul.mubr.bf16.vlgmr.msra.gmra.mxu1 %v2220_v45 }
  0x5a   : > { %1159 = vmatpush1.bf16.msra.mxu0 %v2057_v23  ;;  %1200 = vmatpush1.bf16.msra.mxu1 %v2060_v24 }
  0x5b   : > { %1160 = vmatprep.subr.bf16.mxu0 %v2065_v25  ;;  %1201 = vmatprep.subr.bf16.mxu1 %v2068_v26  ;;  %v383_v26 = vlaneseq }
  0x5c   : > { %1924 = vmatprep.mubr.msk.bf16.mxu0 %vm953_vm0, %v2166_v2  ;;  %1926 = vmatprep.mubr.msk.bf16.mxu1 %vm953_vm0, %v2166_v2  ;;  %v2083_v2 = vld [vmem:[%s2176_s25 + $0x144] ss:$48 sps:$4 sm:$0xff]  }
  0x5e   : > { %1161 = vmatpush1.bf16.msra.mxu0 %v2063_v27  ;;  %1202 = vmatpush1.bf16.msra.mxu1 %v2066_v28  ;;  %v384_v27 = vshrl.u32 %v383_v26, 7 }
  0x5f   : > { %1162 = vmatprep.subr.bf16.mxu0 %v2071_v29  ;;  %1203 = vmatprep.subr.bf16.mxu1 %v2074_v30 }
  0x60   : > { %v385_v28 = vsub.s32 0, %v384_v27 }
  0x62   : > { %1163 = vmatpush1.bf16.msra.mxu0 %v2069_v31  ;;  %1204 = vmatpush1.bf16.msra.mxu1 %v2072_v32  ;;  %v2118_v31 = vmov 1983009808  }
  0x63   : > { %1164 = vmatprep.subr.bf16.mxu0 %v2077_v33  ;;  %1205 = vmatprep.subr.bf16.mxu1 %v2080_v34  ;;  %v1474_v32 = vunpack.c.l.s4 %v2118_v31  ;;  %v379_v33 = vld [vmem:[%s251_s16] sm:$0xff]  ;;  %v393_v34 = vsub.s32 2, %v384_v27 }
  0x66   : > { %1165 = vmatpush1.bf16.msra.mxu0 %v2075_v35  ;;  %1206 = vmatpush1.bf16.msra.mxu1 %v2078_v36  ;;  %v389_v35 = vsub.s32 1, %v384_v27  ;;  %v397_v36 = vsub.s32 3, %v384_v27 }
  0x67   : > { %1166 = vmatprep.subr.bf16.mxu0 %v2083_v2  ;;  %1207 = vmatprep.subr.bf16.mxu1 %v2086_v37  ;;  %v401_v2 = vsub.s32 4, %v384_v27  ;;  %v409_v37 = vsub.s32 6, %v384_v27 }
  0x69   : > { %v402_v51 = vrot.slane %v379_v33, %v401_v2  ;;  %v410_v52 = vrot.slane %v379_v33, %v409_v37 }
  0x6a   : > { %1167 = vmatpush1.bf16.msra.mxu0 %v2081_v38  ;;  %1208 = vmatpush1.bf16.msra.mxu1 %v2084_v39  ;;  %v405_v38 = vsub.s32 5, %v384_v27 }
  0x6b   : > { %1168 = vmatprep.subr.bf16.mxu0 %v2089_v40  ;;  %1209 = vmatprep.subr.bf16.mxu1 %v2092_v41  ;;  %v413_v41 = vsub.s32 7, %v384_v27 }
  0x6e   : > { %1169 = vmatpush1.bf16.msra.mxu0 %v2087_v42  ;;  %1210 = vmatpush1.bf16.msra.mxu1 %v2090_v43  ;;  %v386_v42 = vrot.slane %v379_v33, %v385_v28  ;;  %v380_v43 = vld [vmem:[%s251_s16 + $0x8] sm:$0xf] }
  0x6f   : > { %1170 = vmatprep.subr.bf16.mxu0 %v2095_v44  ;;  %1211 = vmatprep.subr.bf16.mxu1 %v2098_v46  ;;  %v418_v57 = vrot.slane %v380_v43, %v385_v28  ;;  %v426_v58 = vrot.slane %v380_v43, %v393_v34 }
  0x72   : > { %1171 = vmatpush1.bf16.msra.mxu0 %v2093_v47  ;;  %1212 = vmatpush1.bf16.msra.mxu1 %v2096_v48  ;;  %v1475_v47 = vunpack.c.0.s8 %v1474_v32  ;;  %v394_v48 = vrot.slane %v379_v33, %v393_v34 }
  0x73   : > { %1172 = vmatprep.subr.bf16.mxu0 %v2101_v49  ;;  %1213 = vmatprep.subr.bf16.mxu1 %v2104_v50  ;;  %v390_v49 = vrot.slane %v379_v33, %v389_v35  ;;  %v398_v50 = vrot.slane %v379_v33, %v397_v36 }
  0x76   : > { %1173 = vmatpush1.bf16.msra.mxu0 %v2099_v53  ;;  %1214 = vmatpush1.bf16.msra.mxu1 %v2102_v54  ;;  %v406_v53 = vrot.slane %v379_v33, %v405_v38 }
  0x77   : > { %1923 = vmatprep.subr.msk.bf16.mxu0 %vm957_vm1, %v1912_v55  ;;  %1925 = vmatprep.subr.msk.bf16.mxu1 %vm957_vm1, %v1914_v56  ;;  %v414_v56 = vrot.slane %v379_v33, %v413_v41 }
  0x7a   : > { %1189 = vmatpush2.bf16.msra.mxu0 %v983_v59  ;;  %1230 = vmatpush2.bf16.msra.mxu1 %v989_v60  ;;  %v422_v60 = vrot.slane %v380_v43, %v389_v35 }
  0x7b   : > { %1293 = vmatprep.subr.mxu0 %v1249_v61  ;;  %1382 = vmatprep.subr.mxu1 %v1251_v62  ;;  %v430_v61 = vrot.slane %v380_v43, %v397_v36 }
  0x7d   : > { %1191 = vmatmul.mubr.bf16.vlgmr.msra.gmra.mxu0 %v2220_v45  ;;  %1232 = vmatmul.mubr.bf16.vlgmr.msra.gmra.mxu1 %v2220_v45  ;;  %v1241_v45 = vld [vmem:[%s2439_s3 + $0x8] sm:$0xff] }
  0x7e   : > { %1294 = vmatpush1.msra.mxu0 %v1248_v63  ;;  %1383 = vmatpush1.msra.mxu1 %v1250_v0  ;;  %v2338_v0 = vsub.s32 %v1475_v47, %v384_v27 }
  0x7f   : > { %1295 = vmatprep.subr.mxu0 %v1245_v1  ;;  %1384 = vmatprep.subr.mxu1 %v1247_v3 }
  0x80   : > { %1296 = vmatpush1.msra.mxu0 %v1244_v4  ;;  %1385 = vmatpush1.msra.mxu1 %v1246_v5 }
  0x81   : > { %1329 = vmatprep.mubr.f32.mxu0 %v2117_v6  ;;  %1418 = vmatprep.mubr.f32.mxu1 %v2117_v6 }
  0x85   : > { %1927 = vmatmul.mubr.msk.f32.vlgmr.msra.gmra.mxu0 %vm1252_vm2, %v1240_v7  ;;  %1931 = vmatmul.mubr.msk.f32.vlgmr.msra.gmra.mxu1 %vm1252_vm2, %v1240_v7 }
  0x86   : > { %1335 = vmatprep.mubr.f32.mxu0 %v2117_v6  ;;  %1424 = vmatprep.mubr.f32.mxu1 %v2117_v6 }
  0x89   : > { %1928 = vmatmul.mubr.msk.f32.gmra.mxu0 %vm1252_vm2, %v1241_v45  ;;  %1932 = vmatmul.mubr.msk.f32.gmra.mxu1 %vm1252_vm2, %v1241_v45 }
  0x8a   : > { %1341 = vmatprep.mubr.f32.mxu0 %v2117_v6  ;;  %1430 = vmatprep.mubr.f32.mxu1 %v2117_v6 }
  0x8d   : > { %1929 = vmatmul.mubr.msk.f32.gmra.mxu0 %vm1252_vm2, %v1242_v8  ;;  %1933 = vmatmul.mubr.msk.f32.gmra.mxu1 %vm1252_vm2, %v1242_v8 }
  0x8e   : > { %1347 = vmatprep.mubr.f32.mxu0 %v2117_v6  ;;  %1436 = vmatprep.mubr.f32.mxu1 %v2117_v6 }
  0x91   : > { %1930 = vmatmul.mubr.msk.f32.gmra.mxu0 %vm1252_vm2, %v1243_v9  ;;  %1934 = vmatmul.mubr.msk.f32.gmra.mxu1 %vm1252_vm2, %v1243_v9 }
  0xf5   : > { %v1028_v10 = vpop.f32.mrf.mxu0  ;;  %v1069_v11 = vpop.f32.mrf.mxu1 }
  0xf6   : > { %v1029_v59 = vadd.f32 %v1028_v10, %v386_v42  ;;  %v1070_v1 = vadd.f32 %v1069_v11, %v394_v48 }
  0xf7   : > { %v1030_v12 = vpop.f32.mrf.mxu0  ;;  %v1071_v13 = vpop.f32.mrf.mxu1 }
  0xf8   : > { %v2340_v3 = vadd.f32 %v1030_v12, %v390_v49  ;;  %v2342_v6 = vadd.f32 %v1071_v13, %v398_v50 }
  0xf9   : > { %v1032_v14 = vpop.f32.mrf.mxu0  ;;  %v1073_v15 = vpop.f32.mrf.mxu1 }
  0xfb   : > { %v1033_v16 = vpop.f32.mrf.mxu0  ;;  %v1074_v17 = vpop.f32.mrf.mxu1 }
 0x119   : > { %v1110_v18 = vpop.f32.mrf.mxu0  ;;  %v1151_v19 = vpop.f32.mrf.mxu1 }
 0x11a   : > { %v1111_v7 = vadd.f32 %v1110_v18, %v402_v51  ;;  %v1152_v45 = vadd.f32 %v1151_v19, %v410_v52 }
 0x11b   : > { %v1112_v20 = vpop.f32.mrf.mxu0  ;;  %v1153_v21 = vpop.f32.mrf.mxu1 }
 0x11c   : > { %v1113_v8 = vadd.f32 %v1112_v20, %v406_v53  ;;  %v1154_v10 = vadd.f32 %v1153_v21, %v414_v56 }
 0x11d   : > { %v1114_v22 = vpop.f32.mrf.mxu0  ;;  %v1155_v23 = vpop.f32.mrf.mxu1 }
 0x11f   : > { %v1115_v24 = vpop.f32.mrf.mxu0  ;;  %v1156_v25 = vpop.f32.mrf.mxu1 }
 0x13d   : > { %v1192_v29 = vpop.f32.mrf.mxu0  ;;  %v1233_v30 = vpop.f32.mrf.mxu1 }
 0x13e   : > { %v1193_v15 = vadd.f32 %v1192_v29, %v418_v57  ;;  %v1234_v22 = vadd.f32 %v1233_v30, %v426_v58 }
 0x13f   : > { %v1194_v39 = vpop.f32.mrf.mxu0  ;;  %v1235_v40 = vpop.f32.mrf.mxu1 }
 0x140   : > { %v2348_v23 = vadd.f32 %v1194_v39, %v422_v60  ;;  %v2350_v11 = vadd.f32 %v1235_v40, %v430_v61 }
 0x141   : > { %v1196_v44 = vpop.f32.mrf.mxu0  ;;  %v1237_v46 = vpop.f32.mrf.mxu1 }
 0x143   : > { %v1197_v54 = vpop.f32.mrf.mxu0  ;;  %v1238_v55 = vpop.f32.mrf.mxu1 }
 0x145   : > { %v1331_v62 = vpop.f32.mrf.mxu0  ;;  %v1420_v63 = vpop.f32.mrf.mxu1 }
 0x146   : > { %v1494_v4 = vrot.slane %v1331_v62, 2  ;;  %v1610_v5 = vrot.slane %v1331_v62, 4  ;;  %v1496_v16 = vrot.slane %v1420_v63, 2  ;;  %v1612_v17 = vrot.slane %v1420_v63, 4 }
 0x147   : > { %v2344_v9 = vpop.f32.mrf.mxu0  ;;  %v2346_v14 = vpop.f32.mrf.mxu1  ;;  %v1443_v12 = vmul.f32 %v1331_v62, %v1029_v59  ;;  %v1445_v19 = vmul.f32 %v1420_v63, %v1070_v1 }
 0x148   : > { %v2352_v25 = vmul.f32 %v1494_v4, %v1029_v59  ;;  %v2354_v18 = vmul.f32 %v1610_v5, %v1029_v59  ;;  %v2358_v21 = vmul.f32 %v2344_v9, %v2340_v3  ;;  %v2360_v31 = vmul.f32 %v1496_v16, %v1070_v1 }
 0x149   : > { %v1337_v24 = vpop.f32.mrf.mxu0  ;;  %v1426_v13 = vpop.f32.mrf.mxu1  ;;  %v2362_v32 = vmul.f32 %v1612_v17, %v1070_v1  ;;  %v1495_v33 = vrot.slane %v2344_v9, 2  ;;  %v1611_v34 = vrot.slane %v2344_v9, 4  ;;  %v2368_v35 = vmul.f32 %v2346_v14, %v2342_v6 }
 0x14a   : > { %v1526_v20 = vrot.slane %v1337_v24, 2  ;;  %v1638_v26 = vrot.slane %v1337_v24, 4  ;;  %v1528_v27 = vrot.slane %v1426_v13, 2  ;;  %v1640_v28 = vrot.slane %v1426_v13, 4 }
 0x14b   : > { %v1339_v29 = vpop.f32.mrf.mxu0  ;;  %v1428_v30 = vpop.f32.mrf.mxu1  ;;  %v1497_v36 = vrot.slane %v2346_v14, 2  ;;  %v1613_v2 = vrot.slane %v2346_v14, 4  ;;  %v1451_v40 = vmul.f32 %v1337_v24, %v1111_v7  ;;  %v1453_v44 = vmul.f32 %v1426_v13, %v1152_v45 }
 0x14c   : > { %v1534_v37 = vmul.f32 %v1526_v20, %v1111_v7  ;;  %v1646_v41 = vmul.f32 %v1638_v26, %v1111_v7  ;;  %v1527_v42 = vrot.slane %v1339_v29, 2  ;;  %v1639_v43 = vrot.slane %v1339_v29, 4 }
 0x14d   : > { %v1343_v38 = vpop.f32.mrf.mxu0  ;;  %v1432_v39 = vpop.f32.mrf.mxu1  ;;  %v1536_v46 = vmul.f32 %v1528_v27, %v1152_v45  ;;  %v1648_v47 = vmul.f32 %v1640_v28, %v1152_v45  ;;  %v1452_v48 = vmul.f32 %v1339_v29, %v1113_v8  ;;  %v1529_v50 = vrot.slane %v1428_v30, 2 }
 0x14e   : > { %v1641_v51 = vrot.slane %v1428_v30, 4  ;;  %v1558_v52 = vrot.slane %v1343_v38, 2  ;;  %v1666_v53 = vrot.slane %v1343_v38, 4  ;;  %v1542_v55 = vrot.slane %v1534_v37, 6 }
 0x14f   : > { %v1345_v49 = vpop.f32.mrf.mxu0  ;;  %v1434_v54 = vpop.f32.mrf.mxu1  ;;  %v2372_v56 = vmul.f32 %v1428_v30, %v1154_v10  ;;  %v1560_v57 = vrot.slane %v1432_v39, 2  ;;  %v1668_v58 = vrot.slane %v1432_v39, 4  ;;  %v1654_v59 = vrot.slane %v1646_v41, 4 }
 0x150   : > { %v2374_v60 = vmul.f32 %v1527_v42, %v1113_v8  ;;  %v2376_v61 = vmul.f32 %v1639_v43, %v1113_v8  ;;  %v2378_v62 = vmul.f32 %v1558_v52, %v1193_v15  ;;  %v1544_v63 = vrot.slane %v1536_v46, 6 }
 0x151   : > { %v1656_v1 = vrot.slane %v1648_v47, 4  ;;  %v2380_v4 = vmul.f32 %v1666_v53, %v1193_v15  ;;  %v1559_v5 = vrot.slane %v1345_v49, 2  ;;  %v1349_v7 = vpop.f32.mrf.mxu0  ;;  %v2382_v45 = vmul.f32 %v1529_v50, %v1154_v10  ;;  %v1438_v13 = vpop.f32.mrf.mxu1 }
 0x152   : > { %v2384_v16 = vmul.f32 %v1641_v51, %v1154_v10  ;;  %v1459_v17 = vmul.f32 %v1343_v38, %v1193_v15  ;;  %v1461_v24 = vmul.f32 %v1432_v39, %v1234_v22  ;;  %v2386_v20 = vmul.f32 %v1560_v57, %v1234_v22 }
 0x153   : > { %v2388_v26 = vmul.f32 %v1668_v58, %v1234_v22  ;;  %v1460_v8 = vmul.f32 %v1345_v49, %v2348_v23  ;;  %v1667_v27 = vrot.slane %v1345_v49, 4  ;;  %v1574_v28 = vrot.slane %v2378_v62, 6  ;;  %v1351_v41 = vpop.f32.mrf.mxu0 }
 0x154   : > { %v1462_v29 = vmul.f32 %v1434_v54, %v2350_v11  ;;  %v1447_v30 = vadd.f32 %v1443_v12, %v1349_v7  ;;  %v1510_v37 = vrot.slane %v2352_v25, 6  ;;  %v1682_v10 = vrot.slane %v2380_v4, 4 }
 0x155   : > { %v1567_v15 = vmul.f32 %v1559_v5, %v2348_v23  ;;  %v1626_v38 = vrot.slane %v2354_v18, 4  ;;  %v1449_v39 = vadd.f32 %v1445_v19, %v1438_v13  ;;  %v1561_v22 = vrot.slane %v1434_v54, 2 }
 0x156   : > { %v1455_v42 = vadd.f32 %v1451_v40, %v1447_v30  ;;  %v1518_v43 = vadd.f32 %v1510_v37, %v1349_v7  ;;  %v1512_v46 = vrot.slane %v2360_v31, 6  ;;  %v1675_v47 = vmul.f32 %v1667_v27, %v2348_v23  ;;  %v1440_v31 = vpop.f32.mrf.mxu1 }
 0x157   : > { %v1634_v49 = vadd.f32 %v1626_v38, %v1349_v7  ;;  %v1457_v50 = vadd.f32 %v1453_v44, %v1449_v39  ;;  %v1628_v12 = vrot.slane %v2362_v32, 4  ;;  %v1669_v25 = vrot.slane %v1434_v54, 4 }
 0x158   : > { %v1550_v51 = vadd.f32 %v1542_v55, %v1518_v43  ;;  %v1520_v52 = vadd.f32 %v1512_v46, %v1438_v13  ;;  %v1448_v53 = vadd.f32 %v2358_v21, %v1351_v41  ;;  %v1576_v18 = vrot.slane %v2386_v20, 6 }
 0x159   : > { %v1662_v19 = vadd.f32 %v1654_v59, %v1634_v49  ;;  %v1636_v57 = vadd.f32 %v1628_v12, %v1438_v13  ;;  %v1503_v40 = vmul.f32 %v1495_v33, %v2340_v3  ;;  %v1575_v58 = vrot.slane %v1567_v15, 6 }
 0x15a   : > { %v1569_v23 = vmul.f32 %v1561_v22, %v2350_v11  ;;  %v1552_v44 = vadd.f32 %v1544_v63, %v1520_v52  ;;  %v1456_v62 = vadd.f32 %v1452_v48, %v1448_v53  ;;  %v1683_v32 = vrot.slane %v1675_v47, 4 }
 0x15b   : > { %v1664_v54 = vadd.f32 %v1656_v1, %v1636_v57  ;;  %v1511_v55 = vrot.slane %v1503_v40, 6  ;;  %v1619_v21 = vmul.f32 %v1611_v34, %v2340_v3  ;;  %v1677_v59 = vmul.f32 %v1669_v25, %v2350_v11 }
 0x15c   : > { %v1463_v4 = vadd.f32 %v1459_v17, %v1455_v42  ;;  %v1464_v5 = vadd.f32 %v1460_v8, %v1456_v62  ;;  %v1450_v7 = vadd.f32 %v2368_v35, %v1440_v31  ;;  %v1543_v13 = vrot.slane %v2374_v60, 6 }
 0x15d   : > { %v1519_v33 = vadd.f32 %v1511_v55, %v1351_v41  ;;  %v1627_v20 = vrot.slane %v1619_v21, 4  ;;  %v1505_v48 = vmul.f32 %v1497_v36, %v2342_v6  ;;  %v1577_v63 = vrot.slane %v1569_v23, 6 }
 0x15e   : > { %v1471_v1 = vcombine.low %v1463_v4, %v1464_v5  ;;  %v1458_v9 = vadd.f32 %v2372_v56, %v1450_v7  ;;  %v1621_v3 = vmul.f32 %v1613_v2, %v2342_v6  ;;  %v1655_v35 = vrot.slane %v2376_v61, 4 }
 0x15f   : > { %v1551_v11 = vadd.f32 %v1543_v13, %v1519_v33  ;;  %v1635_v34 = vadd.f32 %v1627_v20, %v1351_v41  ;;  %v1513_v17 = vrot.slane %v1505_v48, 6  ;;  %v1582_v60 = vadd.f32 %v1574_v28, %v1550_v51 }
 0x160   : > { %v1465_v8 = vadd.f32 %v1461_v24, %v1457_v50  ;;  %v1466_v27 = vadd.f32 %v1462_v29, %v1458_v9  ;;  %v1629_v30 = vrot.slane %v1621_v3, 4  ;;  %v1545_v38 = vrot.slane %v2382_v45, 6 }
 0x161   : > { %v1583_v37 = vadd.f32 %v1575_v58, %v1551_v11  ;;  %v1663_v15 = vadd.f32 %v1655_v35, %v1635_v34  ;;  %v1521_v36 = vadd.f32 %v1513_v17, %v1440_v31  ;;  %v1479_v56 = vrot.slane %v1471_v1, %v2338_v0 }
 0x162   : > { %v1472_v39 = vcombine.low %v1465_v8, %v1466_v27  ;;  %v1637_v14 = vadd.f32 %v1629_v30, %v1440_v31  ;;  %v1657_v6 = vrot.slane %v2384_v16, 4  ;;  %v1690_v2 = vadd.f32 %v1682_v10, %v1662_v19 }
 0x163   : > { %v1590_v41 = vcombine.low %v1582_v60, %v1583_v37  ;;  %v1691_v61 = vadd.f32 %v1683_v32, %v1663_v15  ;;  %v1553_v22 = vadd.f32 %v1545_v38, %v1521_v36  ;;  %v1684_v24 = vrot.slane %v2388_v26, 4 }
 0x164   : > { %v1685_v28 = vrot.slane %v1677_v59, 4  ;;  %v1486_v29 = vrot.slane %v1472_v39, %v2338_v0  ;;  %v1665_v42 = vadd.f32 %v1657_v6, %v1637_v14  ;;  %v1584_v43 = vadd.f32 %v1576_v18, %v1552_v44 }
 0x165   : > { %v1698_v46 = vcombine.high %v1690_v2, %v1691_v61  ;;  %v1585_v45 = vadd.f32 %v1577_v63, %v1553_v22  ;;  %v1692_v47 = vadd.f32 %v1684_v24, %v1664_v54  ;;  %v1598_v10 = vrot.slane %v1590_v41, %v2338_v0 }
 0x166   : > { %v1487_v49 = vcombine.low %v1479_v56, %v1486_v29  ;;  %v1693_v16 = vadd.f32 %v1685_v28, %v1665_v42 }
 0x167   : > { %v1591_v50 = vcombine.low %v1584_v43, %v1585_v45  ;;  %v1706_v12 = vrot.slane %v1698_v46, %v2338_v0 }
 0x168   : > { %1489 = vst [vmem:[%s261_s21] sm:$0xff] %v1487_v49  ;;  %v1699_v26 = vcombine.high %v1692_v47, %v1693_v16 }
 0x169   : > { %v1605_v25 = vrot.slane %v1591_v50, %v2338_v0 }
 0x16a   : > { %v1713_v51 = vrot.slane %v1699_v26, %v2338_v0 }
 0x16b   : > { %v1606_v52 = vcombine.high %v1598_v10, %v1605_v25 }
 0x16c   : > { %v1714_v53 = vcombine.low %v1706_v12, %v1713_v51 }
 0x16d   : > { %1935 = vst [vmem:[%s261_s21 + $0x8] sm:$0xff] %v1606_v52 }
 0x16e   : > { %1936 = vst [vmem:[%s261_s21 + $0x10] sm:$0xff] %v1714_v53 }
 0x16f PF: > { %s15_s18 = sadd.s32 1, %s2115_s18  }
 0x170   : > { %p12_p4 = scmp.ge.s32.totalorder %s15_s18, 4  }
 0x172   :  { %14 = sbr.rel (!%p12_p4) target bundleno = 1 (0x1), region = 78 }

</bundles_post_ra>
